<compile_context>
chip_gen: v5e
topology: v5e:2x2
jax: 0.10.0
libtpu: 0.0.40
codegen_flags: <defaults>
</compile_context>

<pallas_src>
import functools

import jax
import jax.numpy as jnp
from jax import lax
from jax.experimental import pallas as pl
from jax.experimental.pallas import tpu as pltpu


def _round_up(n, m):
    return ((n + m - 1) // m) * m


def _single_buffered_spec(shape, index_map):
    """BlockSpec for constant / slow-varying operands: one VMEM buffer only."""
    if hasattr(pl, "Buffered"):
        try:
            return pl.BlockSpec(shape, index_map, pipeline_mode=pl.Buffered(1))
        except TypeError:  # very old jax without the pipeline_mode kwarg
            pass
    return pl.BlockSpec(shape, index_map)


def rnn_bptt_kernel(t_valid, t_padded,
                    x_ref, h0_ref, win_ref, whid_ref, wout_ref,
                    o_ref, hT_ref, h_carry, hs_scratch):
    """One grid step == one chunk of t_chunk time steps for one batch block.

    x_ref:      (t_chunk, Bblk, I)   inputs for this chunk (possibly bf16)
    h0_ref:     (Bblk, H)            initial hidden state (used on chunk 0)
    o_ref:      (t_chunk, Bblk, O)   per-step outputs for this chunk
    hT_ref:     (Bblk, H)            final hidden state (written on last chunk)
    h_carry:    VMEM (Bblk, H) f32               hidden carry across chunks
    hs_scratch: VMEM (t_chunk, Bblk, H) f32      chunk input projections,
                                                 overwritten in place with h_t
    """
    c = pl.program_id(1)                  # time-chunk index (inner, arbitrary)
    t_chunk, bblk, idim = x_ref.shape
    hdim = whid_ref.shape[0]
    mask_tail = (t_padded != t_valid)     # static: only last chunk is partial

    @pl.when(c == 0)
    def _():
        h_carry[...] = h0_ref[...].astype(jnp.float32)

    # (1) Chunk-batched input projection: one big-M GEMM instead of T tiny ones.
    x_chunk = x_ref[...].reshape(t_chunk * bblk, idim)
    hs_scratch[...] = jnp.dot(
        x_chunk, win_ref[...], preferred_element_type=jnp.float32
    ).reshape(t_chunk, bblk, hdim)

    # (2) Sequential recurrence: only the (B,H)x(H,H) matmul + tanh per step.
    w_hid = whid_ref[...]  # hoisted load, reused across unrolled iterations

    def step(t, h_prev):
        pre = hs_scratch[t] + jnp.dot(h_prev.astype(w_hid.dtype), w_hid,
                                      preferred_element_type=jnp.float32)
        h_new = jnp.tanh(pre)        # EUP slot; overlaps with MXU work
        hs_scratch[t] = h_new        # stash h_t for the chunk-batched out GEMM
        if mask_tail:
            # Padded time steps (beyond the real sequence) must not advance h.
            h_new = jnp.where(c * t_chunk + t < t_valid, h_new, h_prev)
        return h_new

    h_last = lax.fori_loop(0, t_chunk, step, h_carry[...], unroll=True)
    h_carry[...] = h_last

    # (3) Chunk-batched output projection: (t_chunk*Bblk, H) @ (H, O).
    h_flat = hs_scratch[...].reshape(t_chunk * bblk, hdim).astype(wout_ref.dtype)
    o = jnp.dot(h_flat, wout_ref[...], preferred_element_type=jnp.float32)
    o_ref[...] = o.reshape(t_chunk, bblk, -1).astype(o_ref.dtype)

    # (4) Materialize the final hidden state exactly once (per batch block).
    @pl.when(c == pl.num_programs(1) - 1)
    def _():
        hT_ref[...] = h_last.astype(hT_ref.dtype)


@functools.partial(
    jax.jit,
    static_argnames=("batch_first", "max_time_chunk", "use_bf16",
                     "num_batch_blocks"))
def rnn_bptt_forward(x, h0, w_in, w_hid, w_out, *, batch_first=False,
                     max_time_chunk=64, use_bf16=True, num_batch_blocks=1):
    """x: (T, B, I) if batch_first=False else (B, T, I).
       w_in:(I,H)  w_hid:(H,H)  w_out:(H,O)  (transposed vs torch Linear.weight).
       num_batch_blocks=2 enables the parallel batch axis for 2-TC chips (v7x)."""
    if batch_first:
        x = jnp.transpose(x, (1, 0, 2))
    T, B, I = x.shape
    H = w_hid.shape[0]
    O = w_out.shape[1]
    out_dtype = x.dtype

    nbb = max(1, int(num_batch_blocks))
    # Pad to TPU-friendly shapes; zero padding keeps the math exact
    # (padded hidden components stay identically 0 because tanh(0) == 0).
    Bp = _round_up(B, 8 * nbb)    # sublane (per batch block)
    Bblk = Bp // nbb
    Ip = _round_up(I, 128)        # lane
    Hp = _round_up(H, 128)
    Op = _round_up(O, 128)

    # bf16 MXU operands (f32 accumulation / carry / tanh stay in the kernel).
    mxu_dtype = jnp.bfloat16 if use_bf16 else x.dtype

    xp      = jnp.pad(x,     ((0, 0), (0, Bp - B), (0, Ip - I))).astype(mxu_dtype)
    h0p     = jnp.pad(h0,    ((0, Bp - B), (0, Hp - H)))            # stays f32
    w_in_p  = jnp.pad(w_in,  ((0, Ip - I), (0, Hp - H))).astype(mxu_dtype)
    w_hid_p = jnp.pad(w_hid, ((0, Hp - H), (0, Hp - H))).astype(mxu_dtype)
    w_out_p = jnp.pad(w_out, ((0, Hp - H), (0, Op - O))).astype(mxu_dtype)

    # --- t_chunk from an explicit VMEM budget (fits v7x's 64 MiB with headroom).
    VMEM_BUDGET = 40 * 1024 * 1024
    w_isz  = jnp.dtype(mxu_dtype).itemsize
    x_isz  = jnp.dtype(xp.dtype).itemsize
    o_isz  = jnp.dtype(out_dtype).itemsize
    h0_isz = jnp.dtype(h0p.dtype).itemsize
    fixed = (
        (Ip * Hp + Hp * Hp + Hp * Op) * w_isz   # weights, single-buffered
        + Bblk * Hp * h0_isz                    # h0, single-buffered
        + 2 * Bblk * Hp * o_isz                 # hT output block
        + Bblk * Hp * 4                         # h_carry scratch (f32)
    )
    per_t = Bblk * (2 * Ip * x_isz              # x chunk, double-buffered
                    + 2 * Op * o_isz            # o chunk, double-buffered
                    + Hp * 4)                   # hs_scratch (f32)
    t_cap = max(1, (VMEM_BUDGET - fixed) // per_t) if VMEM_BUDGET > fixed else 1
    t_chunk = max(1, int(min(max_time_chunk, T, t_cap)))

    # Masked tail: pad T up to a multiple of t_chunk instead of shrinking t_chunk.
    num_chunks = int(pl.cdiv(T, t_chunk))
    Tp = num_chunks * t_chunk
    if Tp != T:
        xp = jnp.pad(xp, ((0, Tp - T), (0, 0), (0, 0)))

    out_3d, h_T = pl.pallas_call(
        functools.partial(rnn_bptt_kernel, T, Tp),
        out_shape=(
            jax.ShapeDtypeStruct((Tp, Bp, Op), out_dtype),  # stacked outputs
            jax.ShapeDtypeStruct((Bp, Hp), out_dtype),      # final hidden state
        ),
        grid_spec=pltpu.PrefetchScalarGridSpec(
            num_scalar_prefetch=0,
            grid=(nbb, num_chunks),
            in_specs=[
                pl.BlockSpec((t_chunk, Bblk, Ip), lambda b, c: (c, b, 0)),  # x
                _single_buffered_spec((Bblk, Hp), lambda b, c: (b, 0)),     # h0
                _single_buffered_spec((Ip, Hp),   lambda b, c: (0, 0)),     # W_in
                _single_buffered_spec((Hp, Hp),   lambda b, c: (0, 0)),     # W_hid
                _single_buffered_spec((Hp, Op),   lambda b, c: (0, 0)),     # W_out
            ],
            out_specs=[
                pl.BlockSpec((t_chunk, Bblk, Op), lambda b, c: (c, b, 0)),  # o
                pl.BlockSpec((Bblk, Hp), lambda b, c: (b, 0)),              # h_T
            ],
            scratch_shapes=[
                pltpu.VMEM((Bblk, Hp), jnp.float32),            # hidden carry
                pltpu.VMEM((t_chunk, Bblk, Hp), jnp.float32),   # pre-acts / h_t
            ],
        ),
        compiler_params=pltpu.CompilerParams(
            # Batch blocks are independent (megacore); time chunks are
            # sequentially dependent through the hidden carry.
            dimension_semantics=("parallel", "arbitrary"),
            vmem_limit_bytes=48 * 1024 * 1024,
        ),
    )(xp, h0p, w_in_p, w_hid_p, w_out_p)

    ys = out_3d[:T, :B, :O].reshape(T * B, O)   # == torch.stack(output).view(-1, O)
    h_T = h_T[:B, :H]
    return ys, h_T


def init_params(key, input_size, hidden_size, output_size, dtype=jnp.float32):
    """Deterministic init mimicking torch.nn.Linear (uniform(-1/sqrt(fan_in), +))."""
    k1, k2, k3 = jax.random.split(key, 3)

    def lin(k, fan_in, fan_out):
        bound = 1.0 / (fan_in ** 0.5)
        # stored as (fan_in, fan_out) = transpose of torch's (out, in) weight
        return jax.random.uniform(k, (fan_in, fan_out), dtype,
                                  minval=-bound, maxval=bound)

    w_in = lin(k1, input_size, hidden_size)
    w_hid = lin(k2, hidden_size, hidden_size)
    w_out = lin(k3, hidden_size, output_size)
    return w_in, w_hid, w_out


def rnn_bptt_ref(x, h0, w_in, w_hid, w_out, *, batch_first=False):
    """Pure-JAX reference mirroring the PyTorch loop (for correctness check)."""
    if batch_first:
        x = jnp.transpose(x, (1, 0, 2))
    T = x.shape[0]
    O = w_out.shape[1]
    h = h0
    outs = []
    for t in range(T):
        h = jnp.tanh(x[t] @ w_in + h @ w_hid)
        outs.append(h @ w_out)
    ys = jnp.stack(outs).reshape(-1, O)
    return ys, h


if __name__ == "__main__":
    # Small shapes consistent with the module's forward.
    input_size, hidden_size, output_size = 16, 32, 8
    key = jax.random.PRNGKey(0)
    kx, kh, kp, kx2, kh2 = jax.random.split(key, 5)
    w_in, w_hid, w_out = init_params(kp, input_size, hidden_size, output_size)

    # --- Case 1: exact f32 path, T divisible by chunk, single batch block.
    T, B = 8, 4
    x = jax.random.normal(kx, (T, B, input_size), jnp.float32)   # time-major
    h0 = jax.random.normal(kh, (B, hidden_size), jnp.float32)

    ys, h_T = rnn_bptt_forward(x, h0, w_in, w_hid, w_out,
                               batch_first=False, use_bf16=False)
    ys, h_T = jax.block_until_ready((ys, h_T))
    ys_ref, h_ref = rnn_bptt_ref(x, h0, w_in, w_hid, w_out)
    assert ys.shape == (T * B, output_size)
    assert h_T.shape == (B, hidden_size)
    assert jnp.allclose(ys, ys_ref, atol=1e-5, rtol=1e-5)
    assert jnp.allclose(h_T, h_ref, atol=1e-5, rtol=1e-5)

    # --- Case 2: bf16 MXU operands (f32 accumulate/carry/tanh), loose tolerance.
    ys_b, h_T_b = rnn_bptt_forward(x, h0, w_in, w_hid, w_out,
                                   batch_first=False, use_bf16=True)
    ys_b, h_T_b = jax.block_until_ready((ys_b, h_T_b))
    assert jnp.allclose(ys_b, ys_ref, atol=5e-2, rtol=5e-2)
    assert jnp.allclose(h_T_b, h_ref, atol=5e-2, rtol=5e-2)

    # --- Case 3: awkward T (masked tail), multi-chunk carry, and the
    #             batch-parallel grid axis (2 batch blocks, as used on v7x).
    T2, B2 = 11, 16
    x2 = jax.random.normal(kx2, (T2, B2, input_size), jnp.float32)
    h02 = jax.random.normal(kh2, (B2, hidden_size), jnp.float32)
    ys2, h_T2 = rnn_bptt_forward(x2, h02, w_in, w_hid, w_out,
                                 batch_first=False, use_bf16=False,
                                 max_time_chunk=4, num_batch_blocks=2)
    ys2, h_T2 = jax.block_until_ready((ys2, h_T2))
    ys2_ref, h2_ref = rnn_bptt_ref(x2, h02, w_in, w_hid, w_out)
    assert ys2.shape == (T2 * B2, output_size)
    assert h_T2.shape == (B2, hidden_size)
    assert jnp.allclose(ys2, ys2_ref, atol=1e-5, rtol=1e-5)
    assert jnp.allclose(h_T2, h2_ref, atol=1e-5, rtol=1e-5)

    print("KERNEL_OK")
</pallas_src>

<mosaic_0001>
module attributes {stable_mosaic.version = 11 : i64} {
  func.func @rnn_bptt_kernel(%arg0: i32, %arg1: i32, %arg2: memref<8x8x128xf32, #tpu.memory_space<vmem>>, %arg3: memref<8x128xf32, #tpu.memory_space<vmem>>, %arg4: memref<128x128xf32, #tpu.memory_space<vmem>>, %arg5: memref<128x128xf32, #tpu.memory_space<vmem>>, %arg6: memref<128x128xf32, #tpu.memory_space<vmem>>, %arg7: memref<8x8x128xf32, #tpu.memory_space<vmem>>, %arg8: memref<8x128xf32, #tpu.memory_space<vmem>>, %arg9: memref<8x128xf32, #tpu.memory_space<vmem>>, %arg10: memref<8x8x128xf32, #tpu.memory_space<vmem>>) attributes {dimension_semantics = [#tpu.dimension_semantics<parallel>, #tpu.dimension_semantics<arbitrary>], iteration_bounds = array<i64: 1, 1>, scalar_prefetch = 0 : i64, scratch_operands = 2 : i64, tpu.core_type = #tpu.core_type<tc>, window_params = [{transform_indices = @transform_0, window_bounds = array<i64: 8, 8, 128>}, {pipeline_mode = #tpu.pipeline_mode<synchronous>, transform_indices = @transform_1, window_bounds = array<i64: 8, 128>}, {pipeline_mode = #tpu.pipeline_mode<synchronous>, transform_indices = @transform_2, window_bounds = array<i64: 128, 128>}, {pipeline_mode = #tpu.pipeline_mode<synchronous>, transform_indices = @transform_3, window_bounds = array<i64: 128, 128>}, {pipeline_mode = #tpu.pipeline_mode<synchronous>, transform_indices = @transform_4, window_bounds = array<i64: 128, 128>}, {transform_indices = @transform_5, window_bounds = array<i64: 8, 8, 128>}, {transform_indices = @transform_6, window_bounds = array<i64: 8, 128>}]} {
    %c0_i32 = arith.constant 0 : i32
    %0 = arith.cmpi eq, %arg1, %c0_i32 : i32
    %1 = arith.extui %0 : i1 to i32
    %c0_i32_0 = arith.constant 0 : i32
    %2 = arith.cmpi ne, %1, %c0_i32_0 : i32
    scf.if %2 {
      %c0_66 = arith.constant 0 : index
      %c0_67 = arith.constant 0 : index
      %101 = vector.load %arg3[%c0_66, %c0_67] : memref<8x128xf32, #tpu.memory_space<vmem>>, vector<8x128xf32>
      %c0_68 = arith.constant 0 : index
      %c0_69 = arith.constant 0 : index
      %102 = vector.load %arg9[%c0_68, %c0_69] : memref<8x128xf32, #tpu.memory_space<vmem>>, vector<8x128xf32>
      tpu.vector_store %arg9[%c0_68, %c0_69], %101 {strides = array<i32>} : memref<8x128xf32, #tpu.memory_space<vmem>>, vector<8x128xf32>,
    } else {
    }
    %c0 = arith.constant 0 : index
    %c0_1 = arith.constant 0 : index
    %c0_2 = arith.constant 0 : index
    %3 = vector.load %arg2[%c0, %c0_1, %c0_2] : memref<8x8x128xf32, #tpu.memory_space<vmem>>, vector<8x8x128xf32>
    %4 = vector.shape_cast %3 : vector<8x8x128xf32> to vector<64x128xf32>
    %c0_3 = arith.constant 0 : index
    %c0_4 = arith.constant 0 : index
    %5 = vector.load %arg4[%c0_3, %c0_4] : memref<128x128xf32, #tpu.memory_space<vmem>>, vector<128x128xf32>
    %cst = arith.constant dense<0.000000e+00> : vector<64x128xf32>
    %6 = tpu.matmul %4, %5, %cst {dimension_numbers = #tpu.dot_dimension_numbers<[1], [0], [0], [1], [0, 0, 1, 1], [], []>} : vector<64x128xf32>, vector<128x128xf32>, vector<64x128xf32> -> vector<64x128xf32>
    %7 = vector.shape_cast %6 : vector<64x128xf32> to vector<8x8x128xf32>
    %c0_5 = arith.constant 0 : index
    %c0_6 = arith.constant 0 : index
    %c0_7 = arith.constant 0 : index
    %8 = vector.load %arg10[%c0_5, %c0_6, %c0_7] : memref<8x8x128xf32, #tpu.memory_space<vmem>>, vector<8x8x128xf32>
    tpu.vector_store %arg10[%c0_5, %c0_6, %c0_7], %7 {strides = array<i32>} : memref<8x8x128xf32, #tpu.memory_space<vmem>>, vector<8x8x128xf32>,
    %c0_8 = arith.constant 0 : index
    %c0_9 = arith.constant 0 : index
    %9 = vector.load %arg5[%c0_8, %c0_9] : memref<128x128xf32, #tpu.memory_space<vmem>>, vector<128x128xf32>
    %c0_10 = arith.constant 0 : index
    %c0_11 = arith.constant 0 : index
    %10 = vector.load %arg9[%c0_10, %c0_11] : memref<8x128xf32, #tpu.memory_space<vmem>>, vector<8x128xf32>
    %c0_i32_12 = arith.constant 0 : i32
    %11 = arith.index_cast %c0_i32_12 : i32 to index
    %c0_13 = arith.constant 0 : index
    %c0_14 = arith.constant 0 : index
    %12 = vector.load %arg10[%11, %c0_13, %c0_14] : memref<8x8x128xf32, #tpu.memory_space<vmem>>, vector<1x8x128xf32>
    %13 = vector.shape_cast %12 : vector<1x8x128xf32> to vector<8x128xf32>
    %cst_15 = arith.constant dense<0.000000e+00> : vector<8x128xf32>
    %14 = tpu.matmul %10, %9, %cst_15 {dimension_numbers = #tpu.dot_dimension_numbers<[1], [0], [0], [1], [0, 0, 1, 1], [], []>} : vector<8x128xf32>, vector<128x128xf32>, vector<8x128xf32> -> vector<8x128xf32>
    %15 = arith.addf %13, %14 : vector<8x128xf32>
    %16 = math.tanh %15 : vector<8x128xf32>
    %17 = arith.index_cast %c0_i32_12 : i32 to index
    %c0_16 = arith.constant 0 : index
    %c0_17 = arith.constant 0 : index
    %18 = vector.load %arg10[%17, %c0_16, %c0_17] : memref<8x8x128xf32, #tpu.memory_space<vmem>>, vector<1x8x128xf32>
    %19 = vector.shape_cast %18 : vector<1x8x128xf32> to vector<8x128xf32>
    %20 = vector.shape_cast %16 : vector<8x128xf32> to vector<1x8x128xf32>
    tpu.vector_store %arg10[%17, %c0_16, %c0_17], %20 {strides = array<i32>} : memref<8x8x128xf32, #tpu.memory_space<vmem>>, vector<1x8x128xf32>,
    %c1_i32 = arith.constant 1 : i32
    %21 = arith.index_cast %c1_i32 : i32 to index
    %c0_18 = arith.constant 0 : index
    %c0_19 = arith.constant 0 : index
    %22 = vector.load %arg10[%21, %c0_18, %c0_19] : memref<8x8x128xf32, #tpu.memory_space<vmem>>, vector<1x8x128xf32>
    %23 = vector.shape_cast %22 : vector<1x8x128xf32> to vector<8x128xf32>
    %cst_20 = arith.constant dense<0.000000e+00> : vector<8x128xf32>
    %24 = tpu.matmul %16, %9, %cst_20 {dimension_numbers = #tpu.dot_dimension_numbers<[1], [0], [0], [1], [0, 0, 1, 1], [], []>} : vector<8x128xf32>, vector<128x128xf32>, vector<8x128xf32> -> vector<8x128xf32>
    %25 = arith.addf %23, %24 : vector<8x128xf32>
    %26 = math.tanh %25 : vector<8x128xf32>
    %27 = arith.index_cast %c1_i32 : i32 to index
    %c0_21 = arith.constant 0 : index
    %c0_22 = arith.constant 0 : index
    %28 = vector.load %arg10[%27, %c0_21, %c0_22] : memref<8x8x128xf32, #tpu.memory_space<vmem>>, vector<1x8x128xf32>
    %29 = vector.shape_cast %28 : vector<1x8x128xf32> to vector<8x128xf32>
    %30 = vector.shape_cast %26 : vector<8x128xf32> to vector<1x8x128xf32>
    tpu.vector_store %arg10[%27, %c0_21, %c0_22], %30 {strides = array<i32>} : memref<8x8x128xf32, #tpu.memory_space<vmem>>, vector<1x8x128xf32>,
    %c2_i32 = arith.constant 2 : i32
    %31 = arith.index_cast %c2_i32 : i32 to index
    %c0_23 = arith.constant 0 : index
    %c0_24 = arith.constant 0 : index
    %32 = vector.load %arg10[%31, %c0_23, %c0_24] : memref<8x8x128xf32, #tpu.memory_space<vmem>>, vector<1x8x128xf32>
    %33 = vector.shape_cast %32 : vector<1x8x128xf32> to vector<8x128xf32>
    %cst_25 = arith.constant dense<0.000000e+00> : vector<8x128xf32>
    %34 = tpu.matmul %26, %9, %cst_25 {dimension_numbers = #tpu.dot_dimension_numbers<[1], [0], [0], [1], [0, 0, 1, 1], [], []>} : vector<8x128xf32>, vector<128x128xf32>, vector<8x128xf32> -> vector<8x128xf32>
    %35 = arith.addf %33, %34 : vector<8x128xf32>
    %36 = math.tanh %35 : vector<8x128xf32>
    %37 = arith.index_cast %c2_i32 : i32 to index
    %c0_26 = arith.constant 0 : index
    %c0_27 = arith.constant 0 : index
    %38 = vector.load %arg10[%37, %c0_26, %c0_27] : memref<8x8x128xf32, #tpu.memory_space<vmem>>, vector<1x8x128xf32>
    %39 = vector.shape_cast %38 : vector<1x8x128xf32> to vector<8x128xf32>
    %40 = vector.shape_cast %36 : vector<8x128xf32> to vector<1x8x128xf32>
    tpu.vector_store %arg10[%37, %c0_26, %c0_27], %40 {strides = array<i32>} : memref<8x8x128xf32, #tpu.memory_space<vmem>>, vector<1x8x128xf32>,
    %c3_i32 = arith.constant 3 : i32
    %41 = arith.index_cast %c3_i32 : i32 to index
    %c0_28 = arith.constant 0 : index
    %c0_29 = arith.constant 0 : index
    %42 = vector.load %arg10[%41, %c0_28, %c0_29] : memref<8x8x128xf32, #tpu.memory_space<vmem>>, vector<1x8x128xf32>
    %43 = vector.shape_cast %42 : vector<1x8x128xf32> to vector<8x128xf32>
    %cst_30 = arith.constant dense<0.000000e+00> : vector<8x128xf32>
    %44 = tpu.matmul %36, %9, %cst_30 {dimension_numbers = #tpu.dot_dimension_numbers<[1], [0], [0], [1], [0, 0, 1, 1], [], []>} : vector<8x128xf32>, vector<128x128xf32>, vector<8x128xf32> -> vector<8x128xf32>
    %45 = arith.addf %43, %44 : vector<8x128xf32>
    %46 = math.tanh %45 : vector<8x128xf32>
    %47 = arith.index_cast %c3_i32 : i32 to index
    %c0_31 = arith.constant 0 : index
    %c0_32 = arith.constant 0 : index
    %48 = vector.load %arg10[%47, %c0_31, %c0_32] : memref<8x8x128xf32, #tpu.memory_space<vmem>>, vector<1x8x128xf32>
    %49 = vector.shape_cast %48 : vector<1x8x128xf32> to vector<8x128xf32>
    %50 = vector.shape_cast %46 : vector<8x128xf32> to vector<1x8x128xf32>
    tpu.vector_store %arg10[%47, %c0_31, %c0_32], %50 {strides = array<i32>} : memref<8x8x128xf32, #tpu.memory_space<vmem>>, vector<1x8x128xf32>,
    %c4_i32 = arith.constant 4 : i32
    %51 = arith.index_cast %c4_i32 : i32 to index
    %c0_33 = arith.constant 0 : index
    %c0_34 = arith.constant 0 : index
    %52 = vector.load %arg10[%51, %c0_33, %c0_34] : memref<8x8x128xf32, #tpu.memory_space<vmem>>, vector<1x8x128xf32>
    %53 = vector.shape_cast %52 : vector<1x8x128xf32> to vector<8x128xf32>
    %cst_35 = arith.constant dense<0.000000e+00> : vector<8x128xf32>
    %54 = tpu.matmul %46, %9, %cst_35 {dimension_numbers = #tpu.dot_dimension_numbers<[1], [0], [0], [1], [0, 0, 1, 1], [], []>} : vector<8x128xf32>, vector<128x128xf32>, vector<8x128xf32> -> vector<8x128xf32>
    %55 = arith.addf %53, %54 : vector<8x128xf32>
    %56 = math.tanh %55 : vector<8x128xf32>
    %57 = arith.index_cast %c4_i32 : i32 to index
    %c0_36 = arith.constant 0 : index
    %c0_37 = arith.constant 0 : index
    %58 = vector.load %arg10[%57, %c0_36, %c0_37] : memref<8x8x128xf32, #tpu.memory_space<vmem>>, vector<1x8x128xf32>
    %59 = vector.shape_cast %58 : vector<1x8x128xf32> to vector<8x128xf32>
    %60 = vector.shape_cast %56 : vector<8x128xf32> to vector<1x8x128xf32>
    tpu.vector_store %arg10[%57, %c0_36, %c0_37], %60 {strides = array<i32>} : memref<8x8x128xf32, #tpu.memory_space<vmem>>, vector<1x8x128xf32>,
    %c5_i32 = arith.constant 5 : i32
    %61 = arith.index_cast %c5_i32 : i32 to index
    %c0_38 = arith.constant 0 : index
    %c0_39 = arith.constant 0 : index
    %62 = vector.load %arg10[%61, %c0_38, %c0_39] : memref<8x8x128xf32, #tpu.memory_space<vmem>>, vector<1x8x128xf32>
    %63 = vector.shape_cast %62 : vector<1x8x128xf32> to vector<8x128xf32>
    %cst_40 = arith.constant dense<0.000000e+00> : vector<8x128xf32>
    %64 = tpu.matmul %56, %9, %cst_40 {dimension_numbers = #tpu.dot_dimension_numbers<[1], [0], [0], [1], [0, 0, 1, 1], [], []>} : vector<8x128xf32>, vector<128x128xf32>, vector<8x128xf32> -> vector<8x128xf32>
    %65 = arith.addf %63, %64 : vector<8x128xf32>
    %66 = math.tanh %65 : vector<8x128xf32>
    %67 = arith.index_cast %c5_i32 : i32 to index
    %c0_41 = arith.constant 0 : index
    %c0_42 = arith.constant 0 : index
    %68 = vector.load %arg10[%67, %c0_41, %c0_42] : memref<8x8x128xf32, #tpu.memory_space<vmem>>, vector<1x8x128xf32>
    %69 = vector.shape_cast %68 : vector<1x8x128xf32> to vector<8x128xf32>
    %70 = vector.shape_cast %66 : vector<8x128xf32> to vector<1x8x128xf32>
    tpu.vector_store %arg10[%67, %c0_41, %c0_42], %70 {strides = array<i32>} : memref<8x8x128xf32, #tpu.memory_space<vmem>>, vector<1x8x128xf32>,
    %c6_i32 = arith.constant 6 : i32
    %71 = arith.index_cast %c6_i32 : i32 to index
    %c0_43 = arith.constant 0 : index
    %c0_44 = arith.constant 0 : index
    %72 = vector.load %arg10[%71, %c0_43, %c0_44] : memref<8x8x128xf32, #tpu.memory_space<vmem>>, vector<1x8x128xf32>
    %73 = vector.shape_cast %72 : vector<1x8x128xf32> to vector<8x128xf32>
    %cst_45 = arith.constant dense<0.000000e+00> : vector<8x128xf32>
    %74 = tpu.matmul %66, %9, %cst_45 {dimension_numbers = #tpu.dot_dimension_numbers<[1], [0], [0], [1], [0, 0, 1, 1], [], []>} : vector<8x128xf32>, vector<128x128xf32>, vector<8x128xf32> -> vector<8x128xf32>
    %75 = arith.addf %73, %74 : vector<8x128xf32>
    %76 = math.tanh %75 : vector<8x128xf32>
    %77 = arith.index_cast %c6_i32 : i32 to index
    %c0_46 = arith.constant 0 : index
    %c0_47 = arith.constant 0 : index
    %78 = vector.load %arg10[%77, %c0_46, %c0_47] : memref<8x8x128xf32, #tpu.memory_space<vmem>>, vector<1x8x128xf32>
    %79 = vector.shape_cast %78 : vector<1x8x128xf32> to vector<8x128xf32>
    %80 = vector.shape_cast %76 : vector<8x128xf32> to vector<1x8x128xf32>
    tpu.vector_store %arg10[%77, %c0_46, %c0_47], %80 {strides = array<i32>} : memref<8x8x128xf32, #tpu.memory_space<vmem>>, vector<1x8x128xf32>,
    %c7_i32 = arith.constant 7 : i32
    %81 = arith.index_cast %c7_i32 : i32 to index
    %c0_48 = arith.constant 0 : index
    %c0_49 = arith.constant 0 : index
    %82 = vector.load %arg10[%81, %c0_48, %c0_49] : memref<8x8x128xf32, #tpu.memory_space<vmem>>, vector<1x8x128xf32>
    %83 = vector.shape_cast %82 : vector<1x8x128xf32> to vector<8x128xf32>
    %cst_50 = arith.constant dense<0.000000e+00> : vector<8x128xf32>
    %84 = tpu.matmul %76, %9, %cst_50 {dimension_numbers = #tpu.dot_dimension_numbers<[1], [0], [0], [1], [0, 0, 1, 1], [], []>} : vector<8x128xf32>, vector<128x128xf32>, vector<8x128xf32> -> vector<8x128xf32>
    %85 = arith.addf %83, %84 : vector<8x128xf32>
    %86 = math.tanh %85 : vector<8x128xf32>
    %87 = arith.index_cast %c7_i32 : i32 to index
    %c0_51 = arith.constant 0 : index
    %c0_52 = arith.constant 0 : index
    %88 = vector.load %arg10[%87, %c0_51, %c0_52] : memref<8x8x128xf32, #tpu.memory_space<vmem>>, vector<1x8x128xf32>
    %89 = vector.shape_cast %88 : vector<1x8x128xf32> to vector<8x128xf32>
    %90 = vector.shape_cast %86 : vector<8x128xf32> to vector<1x8x128xf32>
    tpu.vector_store %arg10[%87, %c0_51, %c0_52], %90 {strides = array<i32>} : memref<8x8x128xf32, #tpu.memory_space<vmem>>, vector<1x8x128xf32>,
    %c8_i32 = arith.constant 8 : i32
    %c0_53 = arith.constant 0 : index
    %c0_54 = arith.constant 0 : index
    %91 = vector.load %arg9[%c0_53, %c0_54] : memref<8x128xf32, #tpu.memory_space<vmem>>, vector<8x128xf32>
    tpu.vector_store %arg9[%c0_53, %c0_54], %86 {strides = array<i32>} : memref<8x128xf32, #tpu.memory_space<vmem>>, vector<8x128xf32>,
    %c0_55 = arith.constant 0 : index
    %c0_56 = arith.constant 0 : index
    %c0_57 = arith.constant 0 : index
    %92 = vector.load %arg10[%c0_55, %c0_56, %c0_57] : memref<8x8x128xf32, #tpu.memory_space<vmem>>, vector<8x8x128xf32>
    %93 = vector.shape_cast %92 : vector<8x8x128xf32> to vector<64x128xf32>
    %c0_58 = arith.constant 0 : index
    %c0_59 = arith.constant 0 : index
    %94 = vector.load %arg6[%c0_58, %c0_59] : memref<128x128xf32, #tpu.memory_space<vmem>>, vector<128x128xf32>
    %cst_60 = arith.constant dense<0.000000e+00> : vector<64x128xf32>
    %95 = tpu.matmul %93, %94, %cst_60 {dimension_numbers = #tpu.dot_dimension_numbers<[1], [0], [0], [1], [0, 0, 1, 1], [], []>} : vector<64x128xf32>, vector<128x128xf32>, vector<64x128xf32> -> vector<64x128xf32>
    %96 = vector.shape_cast %95 : vector<64x128xf32> to vector<8x8x128xf32>
    %c0_61 = arith.constant 0 : index
    %c0_62 = arith.constant 0 : index
    %c0_63 = arith.constant 0 : index
    %97 = vector.load %arg7[%c0_61, %c0_62, %c0_63] : memref<8x8x128xf32, #tpu.memory_space<vmem>>, vector<8x8x128xf32>
    tpu.vector_store %arg7[%c0_61, %c0_62, %c0_63], %96 {strides = array<i32>} : memref<8x8x128xf32, #tpu.memory_space<vmem>>, vector<8x8x128xf32>,
    %c0_i32_64 = arith.constant 0 : i32
    %98 = arith.cmpi eq, %arg1, %c0_i32_64 : i32
    %99 = arith.extui %98 : i1 to i32
    %c0_i32_65 = arith.constant 0 : i32
    %100 = arith.cmpi ne, %99, %c0_i32_65 : i32
    scf.if %100 {
      %c0_66 = arith.constant 0 : index
      %c0_67 = arith.constant 0 : index
      %101 = vector.load %arg8[%c0_66, %c0_67] : memref<8x128xf32, #tpu.memory_space<vmem>>, vector<8x128xf32>
      tpu.vector_store %arg8[%c0_66, %c0_67], %86 {strides = array<i32>} : memref<8x128xf32, #tpu.memory_space<vmem>>, vector<8x128xf32>,
    } else {
    }
    return
  }
  func.func @transform_0(%arg0: i32, %arg1: i32) -> (i32, i32, i32) {
    %c0_i32 = arith.constant 0 : i32
    %c0_i32_0 = arith.constant 0 : i32
    return %arg1, %arg0, %c0_i32 : i32, i32, i32
  }
  func.func @transform_1(%arg0: i32, %arg1: i32) -> (i32, i32) {
    %c0_i32 = arith.constant 0 : i32
    %c0_i32_0 = arith.constant 0 : i32
    return %arg0, %c0_i32 : i32, i32
  }
  func.func @transform_2(%arg0: i32, %arg1: i32) -> (i32, i32) {
    %c0_i32 = arith.constant 0 : i32
    %c0_i32_0 = arith.constant 0 : i32
    %c0_i32_1 = arith.constant 0 : i32
    return %c0_i32, %c0_i32_0 : i32, i32
  }
  func.func @transform_3(%arg0: i32, %arg1: i32) -> (i32, i32) {
    %c0_i32 = arith.constant 0 : i32
    %c0_i32_0 = arith.constant 0 : i32
    %c0_i32_1 = arith.constant 0 : i32
    return %c0_i32, %c0_i32_0 : i32, i32
  }
  func.func @transform_4(%arg0: i32, %arg1: i32) -> (i32, i32) {
    %c0_i32 = arith.constant 0 : i32
    %c0_i32_0 = arith.constant 0 : i32
    %c0_i32_1 = arith.constant 0 : i32
    return %c0_i32, %c0_i32_0 : i32, i32
  }
  func.func @transform_5(%arg0: i32, %arg1: i32) -> (i32, i32, i32) {
    %c0_i32 = arith.constant 0 : i32
    %c0_i32_0 = arith.constant 0 : i32
    return %arg1, %arg0, %c0_i32 : i32, i32, i32
  }
  func.func @transform_6(%arg0: i32, %arg1: i32) -> (i32, i32) {
    %c0_i32 = arith.constant 0 : i32
    %c0_i32_0 = arith.constant 0 : i32
    return %arg0, %c0_i32 : i32, i32
  }
}

</mosaic_0001>

<bundles_post_ra>
// kernel: rnn_bptt_forward.1
= control target key start
LH: loop header
LB: loop body
LE: loop exit
PB: predicated region body
PF: predicated region fallthrough
CT: control target
= control target key end

     0   :  { %s816_s2 = inlined_call_operand.vmem [shape: f32[128,128], index: 2, kind: input, shape index: {}]   ;;  %s817_s3 = inlined_call_operand.vmem [shape: f32[128,128], index: 3, kind: input, shape index: {}]   ;;  %s818_s0 = inlined_call_operand.vmem [shape: f32[8,8,128], index: 0, kind: input, shape index: {}]   ;;  %s819_s1 = inlined_call_operand.vmem [shape: f32[8,128], index: 1, kind: input, shape index: {}]   ;;  %s820_s4 = inlined_call_operand.vmem [shape: f32[128,128], index: 4, kind: input, shape index: {}]   ;;  %s821_s5 = inlined_call_operand.vmem [shape: f32[8,8,128], index: 5, kind: output, shape index: {0}]   ;;  %s822_s6 = inlined_call_operand.vmem [shape: f32[8,128], index: 6, kind: output, shape index: {1}]  }
   0x1   :  { %v51_v0 = vld [vmem:[%s816_s2 + $0x78] sm:$0xff]  ;;  %v50_v2 = vld [vmem:[%s816_s2 + $0x70] sm:$0xff]  ;;  %v49_v4 = vld [vmem:[%s816_s2 + $0x68] sm:$0xff] }
   0x2   :  { %v460_v1 = vld [vmem:[%s817_s3 + $0x78] sm:$0xff]  ;;  %52 = vmatpush.msra.mxu0 %v51_v0  ;;  %v469_v3 = vld [vmem:[%s817_s3 + $0x70] sm:$0xff]  ;;  %v477_v5 = vld [vmem:[%s817_s3 + $0x68] sm:$0xff] }
   0x3   :  { %119 = vmatpush.msra.mxu1 %v460_v1  ;;  %144 = vmatpush.msra.mxu3 %v460_v1  ;;  %v48_v6 = vld [vmem:[%s816_s2 + $0x60] sm:$0xff]  ;;  %v47_v8 = vld [vmem:[%s816_s2 + $0x58] sm:$0xff]  ;;  %v46_v10 = vld [vmem:[%s816_s2 + $0x50] sm:$0xff] }
   0x4   :  { %219 = vmatpush.msra.mxu2 %v460_v1  ;;  %53 = vmatpush.msra.mxu0 %v50_v2  ;;  %v488_v7 = vld [vmem:[%s817_s3 + $0x60] sm:$0xff]  ;;  %v499_v9 = vld [vmem:[%s817_s3 + $0x58] sm:$0xff]  ;;  %v510_v11 = vld [vmem:[%s817_s3 + $0x50] sm:$0xff] }
   0x5   :  { %120 = vmatpush.msra.mxu1 %v469_v3  ;;  %145 = vmatpush.msra.mxu3 %v469_v3  ;;  %v45_v12 = vld [vmem:[%s816_s2 + $0x48] sm:$0xff]  ;;  %v44_v14 = vld [vmem:[%s816_s2 + $0x40] sm:$0xff]  ;;  %v43_v16 = vld [vmem:[%s816_s2 + $0x38] sm:$0xff] }
   0x6   :  { %220 = vmatpush.msra.mxu2 %v469_v3  ;;  %54 = vmatpush.msra.mxu0 %v49_v4  ;;  %v521_v13 = vld [vmem:[%s817_s3 + $0x48] sm:$0xff]  ;;  %v532_v15 = vld [vmem:[%s817_s3 + $0x40] sm:$0xff]  ;;  %v543_v17 = vld [vmem:[%s817_s3 + $0x38] sm:$0xff] }
   0x7   :  { %121 = vmatpush.msra.mxu1 %v477_v5  ;;  %146 = vmatpush.msra.mxu3 %v477_v5  ;;  %v42_v18 = vld [vmem:[%s816_s2 + $0x30] sm:$0xff]  ;;  %v41_v20 = vld [vmem:[%s816_s2 + $0x28] sm:$0xff]  ;;  %v40_v22 = vld [vmem:[%s816_s2 + $0x20] sm:$0xff] }
   0x8   :  { %221 = vmatpush.msra.mxu2 %v477_v5  ;;  %55 = vmatpush.msra.mxu0 %v48_v6  ;;  %v554_v19 = vld [vmem:[%s817_s3 + $0x30] sm:$0xff]  ;;  %v565_v21 = vld [vmem:[%s817_s3 + $0x28] sm:$0xff]  ;;  %v576_v23 = vld [vmem:[%s817_s3 + $0x20] sm:$0xff] }
   0x9   :  { %122 = vmatpush.msra.mxu1 %v488_v7  ;;  %147 = vmatpush.msra.mxu3 %v488_v7  ;;  %v39_v24 = vld [vmem:[%s816_s2 + $0x18] sm:$0xff]  ;;  %v38_v26 = vld [vmem:[%s816_s2 + $0x10] sm:$0xff]  ;;  %v37_v28 = vld [vmem:[%s816_s2 + $0x8] sm:$0xff] }
   0xa   :  { %222 = vmatpush.msra.mxu2 %v488_v7  ;;  %56 = vmatpush.msra.mxu0 %v47_v8  ;;  %v587_v25 = vld [vmem:[%s817_s3 + $0x18] sm:$0xff]  ;;  %v598_v27 = vld [vmem:[%s817_s3 + $0x10] sm:$0xff]  ;;  %v609_v29 = vld [vmem:[%s817_s3 + $0x8] sm:$0xff] }
   0xb   :  { %123 = vmatpush.msra.mxu1 %v499_v9  ;;  %148 = vmatpush.msra.mxu3 %v499_v9  ;;  %v36_v30 = vld [vmem:[%s816_s2] sm:$0xff]  ;;  %v29_v34 = vld [vmem:[%s818_s0 + $0x8] sm:$0xff]  ;;  %v30_v39 = vld [vmem:[%s818_s0 + $0x10] sm:$0xff] }
   0xc   :  { %223 = vmatpush.msra.mxu2 %v499_v9  ;;  %57 = vmatpush.msra.mxu0 %v46_v10  ;;  %v620_v31 = vld [vmem:[%s817_s3] sm:$0xff]  ;;  %v31_v44 = vld [vmem:[%s818_s0 + $0x18] sm:$0xff]  ;;  %v340_v46 = vld [vmem:[%s820_s4 + $0x70] sm:$0xff] }
   0xd   :  { %124 = vmatpush.msra.mxu1 %v510_v11  ;;  %149 = vmatpush.msra.mxu3 %v510_v11  ;;  %v28_v32 = vld [vmem:[%s818_s0] sm:$0xff]  ;;  %v341_v45 = vld [vmem:[%s820_s4 + $0x78] sm:$0xff]  ;;  %v339_v47 = vld [vmem:[%s820_s4 + $0x68] sm:$0xff] }
   0xe   :  { %224 = vmatpush.msra.mxu2 %v510_v11  ;;  %58 = vmatpush.msra.mxu0 %v45_v12  ;;  %v26_v33 = vld [vmem:[%s819_s1] sm:$0xff]  ;;  %v337_v49 = vld [vmem:[%s820_s4 + $0x58] sm:$0xff]  ;;  %v336_v50 = vld [vmem:[%s820_s4 + $0x50] sm:$0xff] }
   0xf   :  { %125 = vmatpush.msra.mxu1 %v521_v13  ;;  %150 = vmatpush.msra.mxu3 %v521_v13  ;;  %v338_v48 = vld [vmem:[%s820_s4 + $0x60] sm:$0xff]  ;;  %v335_v51 = vld [vmem:[%s820_s4 + $0x48] sm:$0xff]  ;;  %v333_v57 = vld [vmem:[%s820_s4 + $0x38] sm:$0xff] }
  0x10   :  { %225 = vmatpush.msra.mxu2 %v521_v13  ;;  %59 = vmatpush.msra.mxu0 %v44_v14  ;;  %v334_v56 = vld [vmem:[%s820_s4 + $0x40] sm:$0xff]  ;;  %v332_v58 = vld [vmem:[%s820_s4 + $0x30] sm:$0xff]  ;;  %v331_v59 = vld [vmem:[%s820_s4 + $0x28] sm:$0xff] }
  0x11   :  { %126 = vmatpush.msra.mxu1 %v532_v15  ;;  %151 = vmatpush.msra.mxu3 %v532_v15  ;;  %v330_v60 = vld [vmem:[%s820_s4 + $0x20] sm:$0xff]  ;;  %v329_v61 = vld [vmem:[%s820_s4 + $0x18] sm:$0xff]  ;;  %v328_v62 = vld [vmem:[%s820_s4 + $0x10] sm:$0xff] }
  0x12   :  { %226 = vmatpush.msra.mxu2 %v532_v15  ;;  %60 = vmatpush.msra.mxu0 %v43_v16  ;;  %v32_v63 = vld [vmem:[%s818_s0 + $0x20] sm:$0xff]  ;;  %v327_v0 = vld [vmem:[%s820_s4 + $0x8] sm:$0xff]  ;;  %v34_v10 = vld [vmem:[%s818_s0 + $0x30] sm:$0xff] }
  0x13   :  { %127 = vmatpush.msra.mxu1 %v543_v17  ;;  %152 = vmatpush.msra.mxu3 %v543_v17  ;;  %v33_v6 = vld [vmem:[%s818_s0 + $0x28] sm:$0xff]  ;;  %v35_v16 = vld [vmem:[%s818_s0 + $0x38] sm:$0xff] }
  0x14   :  { %227 = vmatpush.msra.mxu2 %v543_v17  ;;  %61 = vmatpush.msra.mxu0 %v42_v18 }
  0x15   :  { %128 = vmatpush.msra.mxu1 %v554_v19  ;;  %153 = vmatpush.msra.mxu3 %v554_v19 }
  0x16   :  { %228 = vmatpush.msra.mxu2 %v554_v19  ;;  %62 = vmatpush.msra.mxu0 %v41_v20 }
  0x17   :  { %129 = vmatpush.msra.mxu1 %v565_v21  ;;  %154 = vmatpush.msra.mxu3 %v565_v21 }
  0x18   :  { %229 = vmatpush.msra.mxu2 %v565_v21  ;;  %63 = vmatpush.msra.mxu0 %v40_v22 }
  0x19   :  { %130 = vmatpush.msra.mxu1 %v576_v23  ;;  %155 = vmatpush.msra.mxu3 %v576_v23 }
  0x1a   :  { %230 = vmatpush.msra.mxu2 %v576_v23  ;;  %64 = vmatpush.msra.mxu0 %v39_v24 }
  0x1b   :  { %131 = vmatpush.msra.mxu1 %v587_v25  ;;  %156 = vmatpush.msra.mxu3 %v587_v25 }
  0x1c   :  { %231 = vmatpush.msra.mxu2 %v587_v25  ;;  %65 = vmatpush.msra.mxu0 %v38_v26 }
  0x1d   :  { %132 = vmatpush.msra.mxu1 %v598_v27  ;;  %157 = vmatpush.msra.mxu3 %v598_v27 }
  0x1e   :  { %232 = vmatpush.msra.mxu2 %v598_v27  ;;  %66 = vmatpush.msra.mxu0 %v37_v28 }
  0x1f   :  { %133 = vmatpush.msra.mxu1 %v609_v29  ;;  %158 = vmatpush.msra.mxu3 %v609_v29 }
  0x20   :  { %233 = vmatpush.msra.mxu2 %v609_v29  ;;  %67 = vmatpush.msra.mxu0 %v36_v30 }
  0x21   :  { %134 = vmatpush.msra.mxu1 %v620_v31  ;;  %68 = vmatmul.f32.vlgmr.msra.gmra.mxu0 %v28_v32 }
  0x22   :  { %135 = vmatmul.f32.vlgmr.msra.gmra.mxu1 %v26_v33  ;;  %159 = vmatpush.msra.mxu3 %v620_v31 }
  0x23   :  { %194 = vmatpush.msrb.mxu1 %v460_v1  ;;  %234 = vmatpush.msra.mxu2 %v620_v31 }
  0x24   :  { %169 = vmatpush.msrb.mxu3 %v460_v1  ;;  %269 = vmatpush.msrb.mxu0 %v460_v1 }
  0x25   :  { %195 = vmatpush.msrb.mxu1 %v469_v3  ;;  %342 = vmatpush.msrb.mxu2 %v341_v45 }
  0x26   :  { %170 = vmatpush.msrb.mxu3 %v469_v3  ;;  %270 = vmatpush.msrb.mxu0 %v469_v3 }
  0x27   :  { %196 = vmatpush.msrb.mxu1 %v477_v5  ;;  %343 = vmatpush.msrb.mxu2 %v340_v46 }
  0x28   :  { %171 = vmatpush.msrb.mxu3 %v477_v5  ;;  %271 = vmatpush.msrb.mxu0 %v477_v5 }
  0x29   :  { %197 = vmatpush.msrb.mxu1 %v488_v7  ;;  %71 = vmatmul.f32.gmra.mxu0 %v29_v34 }
  0x2a   :  { %172 = vmatpush.msrb.mxu3 %v488_v7  ;;  %272 = vmatpush.msrb.mxu0 %v488_v7 }
  0x2b   :  { %198 = vmatpush.msrb.mxu1 %v499_v9  ;;  %344 = vmatpush.msrb.mxu2 %v339_v47 }
  0x2c   :  { %173 = vmatpush.msrb.mxu3 %v499_v9  ;;  %273 = vmatpush.msrb.mxu0 %v499_v9 }
  0x2d   :  { %199 = vmatpush.msrb.mxu1 %v510_v11  ;;  %345 = vmatpush.msrb.mxu2 %v338_v48 }
  0x2e   :  { %174 = vmatpush.msrb.mxu3 %v510_v11  ;;  %274 = vmatpush.msrb.mxu0 %v510_v11 }
  0x2f   :  { %200 = vmatpush.msrb.mxu1 %v521_v13  ;;  %346 = vmatpush.msrb.mxu2 %v337_v49 }
  0x30   :  { %175 = vmatpush.msrb.mxu3 %v521_v13  ;;  %275 = vmatpush.msrb.mxu0 %v521_v13 }
  0x31   :  { %201 = vmatpush.msrb.mxu1 %v532_v15  ;;  %74 = vmatmul.f32.gmra.mxu0 %v30_v39 }
  0x32   :  { %176 = vmatpush.msrb.mxu3 %v532_v15  ;;  %276 = vmatpush.msrb.mxu0 %v532_v15 }
  0x33   :  { %202 = vmatpush.msrb.mxu1 %v543_v17  ;;  %347 = vmatpush.msrb.mxu2 %v336_v50 }
  0x34   :  { %177 = vmatpush.msrb.mxu3 %v543_v17  ;;  %277 = vmatpush.msrb.mxu0 %v543_v17 }
  0x35   :  { %203 = vmatpush.msrb.mxu1 %v554_v19  ;;  %348 = vmatpush.msrb.mxu2 %v335_v51 }
  0x36   :  { %178 = vmatpush.msrb.mxu3 %v554_v19  ;;  %278 = vmatpush.msrb.mxu0 %v554_v19 }
  0x37   :  { %204 = vmatpush.msrb.mxu1 %v565_v21  ;;  %349 = vmatpush.msrb.mxu2 %v334_v56 }
  0x38   :  { %179 = vmatpush.msrb.mxu3 %v565_v21  ;;  %279 = vmatpush.msrb.mxu0 %v565_v21 }
  0x39   :  { %205 = vmatpush.msrb.mxu1 %v576_v23  ;;  %77 = vmatmul.f32.gmra.mxu0 %v31_v44 }
  0x3a   :  { %180 = vmatpush.msrb.mxu3 %v576_v23  ;;  %280 = vmatpush.msrb.mxu0 %v576_v23 }
  0x3b   :  { %206 = vmatpush.msrb.mxu1 %v587_v25  ;;  %350 = vmatpush.msrb.mxu2 %v333_v57 }
  0x3c   :  { %181 = vmatpush.msrb.mxu3 %v587_v25  ;;  %281 = vmatpush.msrb.mxu0 %v587_v25 }
  0x3d   :  { %207 = vmatpush.msrb.mxu1 %v598_v27  ;;  %351 = vmatpush.msrb.mxu2 %v332_v58 }
  0x3e   :  { %182 = vmatpush.msrb.mxu3 %v598_v27  ;;  %282 = vmatpush.msrb.mxu0 %v598_v27 }
  0x3f   :  { %208 = vmatpush.msrb.mxu1 %v609_v29  ;;  %352 = vmatpush.msrb.mxu2 %v331_v59 }
  0x40   :  { %183 = vmatpush.msrb.mxu3 %v609_v29  ;;  %283 = vmatpush.msrb.mxu0 %v609_v29 }
  0x41   :  { %209 = vmatpush.msrb.mxu1 %v620_v31  ;;  %353 = vmatpush.msrb.mxu2 %v330_v60 }
  0x42   :  { %184 = vmatpush.msrb.mxu3 %v620_v31  ;;  %284 = vmatpush.msrb.mxu0 %v620_v31 }
  0x43   :  { %294 = vmatpush.msra.mxu1 %v460_v1  ;;  %354 = vmatpush.msrb.mxu2 %v329_v61 }
  0x44   :  { %80 = vmatmul.f32.gmra.mxu0 %v32_v63 }
  0x45   :  { %295 = vmatpush.msra.mxu1 %v469_v3  ;;  %355 = vmatpush.msrb.mxu2 %v328_v62 }
  0x47   :  { %296 = vmatpush.msra.mxu1 %v477_v5  ;;  %356 = vmatpush.msrb.mxu2 %v327_v0 }
  0x49   :  { %297 = vmatpush.msra.mxu1 %v488_v7 }
  0x4b   :  { %298 = vmatpush.msra.mxu1 %v499_v9 }
  0x4c   :  { %83 = vmatmul.f32.gmra.mxu0 %v33_v6 }
  0x4d   :  { %299 = vmatpush.msra.mxu1 %v510_v11 }
  0x4f   :  { %300 = vmatpush.msra.mxu1 %v521_v13 }
  0x51   :  { %301 = vmatpush.msra.mxu1 %v532_v15 }
  0x53   :  { %302 = vmatpush.msra.mxu1 %v543_v17 }
  0x54   :  { %86 = vmatmul.f32.gmra.mxu0 %v34_v10 }
  0x55   :  { %303 = vmatpush.msra.mxu1 %v554_v19 }
  0x57   :  { %304 = vmatpush.msra.mxu1 %v565_v21 }
  0x59   :  { %305 = vmatpush.msra.mxu1 %v576_v23 }
  0x5b   :  { %306 = vmatpush.msra.mxu1 %v587_v25 }
  0x5c   :  { %89 = vmatmul.f32.gmra.mxu0 %v35_v16 }
  0x5d   :  { %307 = vmatpush.msra.mxu1 %v598_v27 }
  0x5f   :  { %308 = vmatpush.msra.mxu1 %v609_v29 }
  0x61   :  { %309 = vmatpush.msra.mxu1 %v620_v31 }
  0x9e   :  { %v69_v35 = vpop.f32.mrf.mxu0 }
  0x9f   :  { %v136_v36 = vpop.f32.mrf.mxu1 }
  0xa0   :  { %v139_v37 = vadd.f32 %v136_v36, %v69_v35 }
  0xa2   :  { %403 = vtanh.f32 %v139_v37 }
  0xa6   :  { %v72_v40 = vpop.f32.mrf.mxu0 }
  0xa8   :  { %v703_v38 = vpop.eup %403 }
  0xa9   :  { %160 = vmatmul.f32.vlgmr.msra.gmra.mxu3 %v703_v38 }
  0xaa   :  { %244 = vmatpush.msra.mxu3 %v460_v1  ;;  %v326_v1 = vld [vmem:[%s820_s4] sm:$0xff] }
  0xab   :  { %357 = vmatpush.msrb.mxu2 %v326_v1 }
  0xac   :  { %245 = vmatpush.msra.mxu3 %v469_v3 }
  0xae   :  { %246 = vmatpush.msra.mxu3 %v477_v5  ;;  %v75_v52 = vpop.f32.mrf.mxu0 }
  0xb0   :  { %247 = vmatpush.msra.mxu3 %v488_v7 }
  0xb2   :  { %248 = vmatpush.msra.mxu3 %v499_v9 }
  0xb4   :  { %249 = vmatpush.msra.mxu3 %v510_v11 }
  0xb6   :  { %250 = vmatpush.msra.mxu3 %v521_v13  ;;  %v78_v2 = vpop.f32.mrf.mxu0 }
  0xb8   :  { %251 = vmatpush.msra.mxu3 %v532_v15 }
  0xba   :  { %252 = vmatpush.msra.mxu3 %v543_v17 }
  0xbc   :  { %253 = vmatpush.msra.mxu3 %v554_v19 }
  0xbe   :  { %254 = vmatpush.msra.mxu3 %v565_v21 }
  0xc0   :  { %255 = vmatpush.msra.mxu3 %v576_v23 }
  0xc1   :  { %v81_v7 = vpop.f32.mrf.mxu0 }
  0xc2   :  { %256 = vmatpush.msra.mxu3 %v587_v25 }
  0xc4   :  { %257 = vmatpush.msra.mxu3 %v598_v27 }
  0xc6   :  { %258 = vmatpush.msra.mxu3 %v609_v29 }
  0xc8   :  { %259 = vmatpush.msra.mxu3 %v620_v31 }
  0xc9   :  { %v84_v17 = vpop.f32.mrf.mxu0 }
  0xd1   :  { %v87_v22 = vpop.f32.mrf.mxu0 }
  0xd9   :  { %v90_v23 = vpop.f32.mrf.mxu0 }
 0x12c   :  { %v161_v41 = vpop.f32.mrf.mxu3 }
 0x12d   :  { %v164_v42 = vadd.f32 %v161_v41, %v72_v40 }
 0x12f   :  { %405 = vtanh.f32 %v164_v42 }
 0x135   :  { %v406_v43 = vpop.eup %405 }
 0x136   :  { %185 = vmatmul.f32.vlgmr.msrb.gmra.mxu3 %v406_v43 }
 0x1b9   :  { %v186_v53 = vpop.f32.mrf.mxu3 }
 0x1ba   :  { %v189_v54 = vadd.f32 %v186_v53, %v75_v52 }
 0x1bc   :  { %407 = vtanh.f32 %v189_v54 }
 0x1c2   :  { %v408_v55 = vpop.eup %407 }
 0x1c3   :  { %210 = vmatmul.f32.vlgmr.msrb.gmra.mxu1 %v408_v55 }
 0x240   :  { %v211_v3 = vpop.f32.mrf.mxu1 }
 0x241   :  { %v214_v4 = vadd.f32 %v211_v3, %v78_v2 }
 0x243   :  { %409 = vtanh.f32 %v214_v4 }
 0x249   :  { %v410_v5 = vpop.eup %409 }
 0x24a   :  { %235 = vmatmul.f32.vlgmr.msra.gmra.mxu2 %v410_v5 }
 0x252   :  { %358 = vmatmul.f32.vlgmr.msrb.gmra.mxu2 %v703_v38 }
 0x25a   :  { %361 = vmatmul.f32.gmra.mxu2 %v406_v43 }
 0x262   :  { %364 = vmatmul.f32.gmra.mxu2 %v408_v55 }
 0x26a   :  { %367 = vmatmul.f32.gmra.mxu2 %v410_v5 }
 0x2cd   :  { %v236_v8 = vpop.f32.mrf.mxu2 }
 0x2ce   :  { %v239_v9 = vadd.f32 %v236_v8, %v81_v7 }
 0x2d0   :  { %411 = vtanh.f32 %v239_v9 }
 0x2d5   :  { %v359_v11 = vpop.f32.mrf.mxu2 }
 0x2d6   :  { %v412_v12 = vpop.eup %411  ;;  %383 = vst [vmem:[%s821_s5] sm:$0xff] %v359_v11 }
 0x2d7   :  { %260 = vmatmul.f32.vlgmr.msra.gmra.mxu3 %v412_v12  ;;  %370 = vmatmul.f32.gmra.mxu2 %v412_v12 }
 0x2dd   :  { %v362_v13 = vpop.f32.mrf.mxu2 }
 0x2de   :  { %384 = vst [vmem:[%s821_s5 + $0x8] sm:$0xff] %v362_v13 }
 0x2e5   :  { %v365_v14 = vpop.f32.mrf.mxu2 }
 0x2e6   :  { %385 = vst [vmem:[%s821_s5 + $0x10] sm:$0xff] %v365_v14 }
 0x2ed   :  { %v368_v15 = vpop.f32.mrf.mxu2 }
 0x2ee   :  { %386 = vst [vmem:[%s821_s5 + $0x18] sm:$0xff] %v368_v15 }
 0x35a   :  { %v261_v18 = vpop.f32.mrf.mxu3  ;;  %v371_v19 = vpop.f32.mrf.mxu2 }
 0x35b   :  { %v264_v20 = vadd.f32 %v261_v18, %v84_v17  ;;  %387 = vst [vmem:[%s821_s5 + $0x20] sm:$0xff] %v371_v19 }
 0x35d   :  { %413 = vtanh.f32 %v264_v20 }
 0x363   :  { %v414_v21 = vpop.eup %413 }
 0x364   :  { %285 = vmatmul.f32.vlgmr.msrb.gmra.mxu0 %v414_v21  ;;  %373 = vmatmul.f32.gmra.mxu2 %v414_v21 }
 0x3e1   :  { %v286_v24 = vpop.f32.mrf.mxu0 }
 0x3e2   :  { %v289_v25 = vadd.f32 %v286_v24, %v87_v22 }
 0x3e4   :  { %415 = vtanh.f32 %v289_v25 }
 0x3e7   :  { %v374_v26 = vpop.f32.mrf.mxu2 }
 0x3e8   :  { %388 = vst [vmem:[%s821_s5 + $0x28] sm:$0xff] %v374_v26 }
 0x3ea   :  { %v416_v27 = vpop.eup %415 }
 0x3eb   :  { %310 = vmatmul.f32.vlgmr.msra.gmra.mxu1 %v416_v27  ;;  %376 = vmatmul.f32.gmra.mxu2 %v416_v27 }
 0x468   :  { %v311_v28 = vpop.f32.mrf.mxu1 }
 0x469   :  { %v314_v29 = vadd.f32 %v311_v28, %v90_v23 }
 0x46b   :  { %417 = vtanh.f32 %v314_v29 }
 0x46e   :  { %v377_v30 = vpop.f32.mrf.mxu2 }
 0x46f   :  { %389 = vst [vmem:[%s821_s5 + $0x30] sm:$0xff] %v377_v30 }
 0x471   :  { %v418_v31 = vpop.eup %417 }
 0x472   :  { %394 = vst [vmem:[%s822_s6] sm:$0xff] %v418_v31  ;;  %379 = vmatmul.f32.gmra.mxu2 %v418_v31 }
 0x4f5   :  { %v380_v32 = vpop.f32.mrf.mxu2 }
 0x4f6   :  { %390 = vst [vmem:[%s821_s5 + $0x38] sm:$0xff] %v380_v32 }

</bundles_post_ra>
